<compile_context>
chip_gen: v5e
topology: v5e:2x2
jax: 0.10.0
libtpu: 0.0.40
codegen_flags: <defaults>
</compile_context>

<pallas_src>
import jax
import jax.numpy as jnp
from jax import lax
from jax.experimental import pallas as pl
from jax.experimental.pallas import tpu as pltpu

_LANE = 128


def _matmul_bias_relu_kernel(x_ref, w_ref, b_ref, o_ref):
    """One row tile of the K-folded conv: o = relu(x @ w + b).

    x_ref: (tp, kdim) compute dtype     w_ref: (kdim, cout_p) compute dtype
    b_ref: (1, cout_p) f32              o_ref: (tp, cout_p) activation dtype
    """
    acc = jnp.dot(x_ref[...], w_ref[...], preferred_element_type=jnp.float32)
    o_ref[...] = jnp.maximum(acc + b_ref[...], 0.0).astype(o_ref.dtype)


def _cdiv(a, b):
    return -(-a // b)


def _round_up(x, m):
    return _cdiv(x, m) * m


def _vmem_cap_bytes():
    """~72% of this generation's physical VMEM (v5e/v6e 128 MiB, v7x 64 MiB)."""
    try:
        info = pltpu.get_tpu_info()
        phys = int(getattr(info, "vmem_capacity_bytes", 64 << 20))
    except Exception:
        phys = 64 << 20                       # conservative (v7x-sized) default
    return int(phys * 0.72)


def _vmem_need_bytes(tp, kdim, cout_p, in_itemsize, out_itemsize, w_buffers):
    x_tiles = 2 * tp * kdim * in_itemsize       # double-buffered LHS row tiles
    o_tiles = 2 * tp * cout_p * out_itemsize    # double-buffered output tiles
    acc_tmp = tp * cout_p * 4                   # f32 dot-result temporary
    w_bytes = w_buffers * kdim * cout_p * in_itemsize
    b_bytes = w_buffers * 8 * max(cout_p, _LANE) * 4   # (1,cout) -> 8 sublanes
    return x_tiles + o_tiles + acc_tmp + w_bytes + b_bytes


def _even_tiles(n_tiles):
    # Even tile counts keep v7x's two TensorCores balanced on the "parallel"
    # row axis (an odd count > 1 leaves a 50% imbalance / an idle core).
    if n_tiles > 1 and n_tiles % 2:
        n_tiles += 1
    return n_tiles


def _choose_row_tiling(prows):
    """Pick (rows-per-tile, tile-count): ~512-row tiles, even count, low pad."""
    r8 = _round_up(max(prows, 8), 8)
    n = _cdiv(r8, 512)
    if r8 >= 16:
        n = max(n, 2)
    n = _even_tiles(n)
    tp = _round_up(_cdiv(r8, n), 8)
    return tp, n


def _resident_spec(block_shape, single_buffer):
    """BlockSpec for a VMEM-resident operand (constant index_map).

    With single_buffer=True we also request a 1-deep pipeline so the resident
    weights/bias occupy a single VMEM buffer instead of the default two.
    """
    index_map = lambda i: (0, 0)
    if single_buffer:
        try:
            return pl.BlockSpec(block_shape, index_map,
                                pipeline_mode=pl.Buffered(1))
        except (TypeError, AttributeError):
            pass
    return pl.BlockSpec(block_shape, index_map)


def conv3x3_relu(x_nhwc, w, b, stride, compute_dtype=jnp.bfloat16,
                 out_dtype=None):
    """3x3 conv (padding=1, given stride) + bias + ReLU on an NHWC tensor.

    x_nhwc: (N, H, W, Cin)   w: (3, 3, Cin, Cout) HWIO   b: (Cout,)
    Returns (N, Ho, Wo, Cout) in out_dtype (default: compute_dtype); the MXU
    accumulates in f32 and the bias/ReLU epilogue runs in f32.
    """
    if out_dtype is None:
        out_dtype = compute_dtype
    N, H, W, Cin = x_nhwc.shape
    Cout = w.shape[-1]
    s = stride
    Ho = (H + 2 - 3) // s + 1
    Wo = (W + 2 - 3) // s + 1
    K = 9 * Cin
    rows = N * Ho * Wo

    # K-folded im2col slab, materialized directly in compute_dtype (bf16 by
    # default): cast BEFORE pad/concat so no f32 copy of the 9x slab ever hits
    # HBM.  Tap order (dy, dx, cin) matches w.reshape(9*Cin, Cout) row-major.
    # TODO(synk): replace the slab with halo row-tiles + in-kernel tap
    # accumulation (manual make_async_copy windows) to cut activation reads a
    # further 2-9x; omitted here to stay on block-granular BlockSpecs.
    x_pad = jnp.pad(x_nhwc.astype(compute_dtype),
                    ((0, 0), (1, 1), (1, 1), (0, 0)))
    patches = [x_pad[:, dy::s, dx::s, :][:, :Ho, :Wo, :]
               for dy in range(3) for dx in range(3)]
    x2d = jnp.concatenate(patches, axis=-1).reshape(rows, K)

    # Lane-dense outputs: if Cout < 128 (layer 1: Cout=64), pack `pack`
    # adjacent output pixels per 128-lane row.  The LHS packs `pack` patches
    # per row and the RHS becomes block-diagonal kron(I_pack, W), so the kernel
    # is still one plain matmul and the stores are full-width (no vst.msk).
    pack = _LANE // Cout if (Cout < _LANE and _LANE % Cout == 0) else 1
    kdim, cout_p = pack * K, pack * Cout

    w2d = w.reshape(K, Cout).astype(compute_dtype)
    if pack > 1:
        w2d = jnp.kron(jnp.eye(pack, dtype=w2d.dtype), w2d)  # (pack*K, pack*Cout)
    b2d = jnp.tile(b.astype(jnp.float32), pack).reshape(1, cout_p)

    # Row tiling (in packed-row units): ~512-row tiles, even tile count, then
    # shrink until the estimated working set fits this generation's VMEM.
    prows = _cdiv(rows, pack)
    tp, n_tiles = _choose_row_tiling(prows)
    in_sz = jnp.dtype(compute_dtype).itemsize
    out_sz = jnp.dtype(out_dtype).itemsize
    cap = _vmem_cap_bytes()
    margin = 2 << 20

    def est_need(tp_):
        # Conservative: assume double-buffered resident weights (fallback path).
        return _vmem_need_bytes(tp_, kdim, cout_p, in_sz, out_sz, 2)

    while est_need(tp) + margin > cap and tp > 8:
        tp = _round_up(max(tp // 2, 8), 8)
        n_tiles = _even_tiles(_cdiv(_round_up(max(prows, 8), 8), tp))

    prows_pad = tp * n_tiles
    rows_pad = prows_pad * pack
    if rows_pad != rows:
        x2d = jnp.pad(x2d, ((0, rows_pad - rows), (0, 0)))
    x2d = x2d.reshape(prows_pad, kdim)

    # Always set an explicit VMEM limit: at least 32 MiB (fixes v5e's 16 MiB
    # scoped default on the K=2304/Cout=512 layer, f32 dot temp included) but
    # never above ~72% of physical VMEM (v7x is a 64 MiB chip).
    vmem_limit = int(min(cap, max(32 << 20, int(est_need(tp) * 1.5) + (8 << 20))))

    def run(single_buffer_resident):
        grid_spec = pltpu.PrefetchScalarGridSpec(
            num_scalar_prefetch=0,
            grid=(n_tiles,),
            in_specs=[
                pl.BlockSpec((tp, kdim), lambda i: (i, 0)),
                _resident_spec((kdim, cout_p), single_buffer_resident),
                _resident_spec((1, cout_p), single_buffer_resident),
            ],
            out_specs=pl.BlockSpec((tp, cout_p), lambda i: (i, 0)),
        )
        return pl.pallas_call(
            _matmul_bias_relu_kernel,
            out_shape=jax.ShapeDtypeStruct((prows_pad, cout_p), out_dtype),
            grid_spec=grid_spec,
            compiler_params=pltpu.CompilerParams(
                dimension_semantics=("parallel",),
                vmem_limit_bytes=vmem_limit),
        )(x2d, w2d, b2d)

    try:
        out2d = run(True)
    except Exception:
        # pl.Buffered(1) not supported by this JAX/Mosaic build: fall back to
        # the default double-buffered pipeline for the resident operands.
        out2d = run(False)

    out = out2d.reshape(rows_pad, Cout)[:rows]
    return out.reshape(N, Ho, Wo, Cout)


def init_params(key):
    """Deterministic synthetic weights matching the module's layer shapes."""
    specs = [(3, 64), (64, 128), (128, 256), (256, 512)]
    params = []
    for i, (cin, cout) in enumerate(specs):
        kw, kb = jax.random.split(jax.random.fold_in(key, i))
        w = jax.random.normal(kw, (3, 3, cin, cout), jnp.float32) * \
            (2.0 / (9 * cin)) ** 0.5
        b = jax.random.normal(kb, (cout,), jnp.float32) * 0.01
        params.append((w, b))
    return params


def iframe_feat_extractor(x, params, compute_dtype=jnp.bfloat16,
                          out_dtype=jnp.float32, output_layout="NCHW"):
    """x: (N, 3, 1, H, W) as in the PyTorch module (x.squeeze(2) removes T).

    Intermediate activations live in compute_dtype (bf16 by default) to halve
    inter-layer HBM traffic; the returned maps are cast to out_dtype with the
    cast fused into the final relayout.  output_layout="NCHW" matches PyTorch
    exactly (one relayout pass per output); "NHWC" skips those passes.
    """
    x = jnp.squeeze(x, axis=2)               # (N, 3, H, W)  NCHW
    x = jnp.transpose(x, (0, 2, 3, 1))       # NHWC for the lane-dense kernels
    (w1, b1), (w2, b2), (w3, b3), (w4, b4) = params
    x1 = conv3x3_relu(x, w1, b1, 1, compute_dtype)    # (N, H,   W,   64)
    x2 = conv3x3_relu(x1, w2, b2, 2, compute_dtype)   # (N, H/2, W/2, 128)
    x3 = conv3x3_relu(x2, w3, b3, 2, compute_dtype)   # (N, H/4, W/4, 256)
    x4 = conv3x3_relu(x3, w4, b4, 2, compute_dtype)   # (N, H/8, W/8, 512)

    def finish(t):
        t = t.astype(out_dtype)
        if output_layout == "NCHW":
            t = jnp.transpose(t, (0, 3, 1, 2))
        return t

    return {'512': finish(x4), '256': finish(x3),
            '128': finish(x2), '64': finish(x1)}


def _ref_conv3x3_relu(x_nhwc, w, b, s, compute_dtype):
    """Plain-JAX reference applying the same dtype rounding as the kernel path."""
    y = lax.conv_general_dilated(
        x_nhwc.astype(compute_dtype), w.astype(compute_dtype),
        window_strides=(s, s), padding=((1, 1), (1, 1)),
        dimension_numbers=('NHWC', 'HWIO', 'NHWC'),
        preferred_element_type=jnp.float32)
    return jnp.maximum(y + b.astype(jnp.float32), 0.0).astype(compute_dtype)


if __name__ == "__main__":
    key = jax.random.PRNGKey(0)
    kx, kp = jax.random.split(key)

    N, H, W = 2, 16, 16
    x = jax.random.normal(kx, (N, 3, 1, H, W), jnp.float32)
    params = init_params(kp)

    # Check both the bf16 (default, MXU-friendly) and f32 compute paths against
    # plain-JAX conv references that apply the same compute-dtype rounding.
    # (For strict f32 parity with an f32 PyTorch module, pass compute_dtype=f32.)
    for cdt, tol in ((jnp.bfloat16, 5e-3), (jnp.float32, 1e-3)):
        out = iframe_feat_extractor(x, params, compute_dtype=cdt)
        out = jax.block_until_ready(out)

        # Shape / dtype checks (match PyTorch NCHW f32 outputs).
        assert out['64'].shape == (N, 64, H, W)
        assert out['128'].shape == (N, 128, H // 2, W // 2)
        assert out['256'].shape == (N, 256, H // 4, W // 4)
        assert out['512'].shape == (N, 512, H // 8, W // 8)
        assert all(v.dtype == jnp.float32 for v in out.values())

        xh = jnp.transpose(jnp.squeeze(x, 2), (0, 2, 3, 1))
        r1 = _ref_conv3x3_relu(xh, *params[0], 1, cdt)
        r2 = _ref_conv3x3_relu(r1, *params[1], 2, cdt)
        r3 = _ref_conv3x3_relu(r2, *params[2], 2, cdt)
        r4 = _ref_conv3x3_relu(r3, *params[3], 2, cdt)
        refs = {'64': r1, '128': r2, '256': r3, '512': r4}
        for k, r in refs.items():
            got = jnp.transpose(out[k], (0, 2, 3, 1)).astype(jnp.float32)
            ref = r.astype(jnp.float32)
            assert jnp.allclose(got, ref, atol=tol, rtol=tol), \
                f"mismatch at {k} ({jnp.dtype(cdt).name})"

    print("KERNEL_OK")
</pallas_src>

<mosaic_0001>
module attributes {stable_mosaic.version = 11 : i64} {
  func.func @_matmul_bias_relu_kernel(%arg0: i32, %arg1: memref<128x54xbf16, #tpu.memory_space<vmem>>, %arg2: memref<54x128xbf16, #tpu.memory_space<vmem>>, %arg3: memref<1x128xf32, #tpu.memory_space<vmem>>, %arg4: memref<128x128xbf16, #tpu.memory_space<vmem>>) attributes {dimension_semantics = [#tpu.dimension_semantics<parallel>], iteration_bounds = array<i64: 2>, scalar_prefetch = 0 : i64, scratch_operands = 0 : i64, tpu.core_type = #tpu.core_type<tc>, window_params = [{transform_indices = @transform_0, window_bounds = array<i64: 128, 54>}, {pipeline_mode = #tpu.pipeline_mode<synchronous>, transform_indices = @transform_1, window_bounds = array<i64: 54, 128>}, {pipeline_mode = #tpu.pipeline_mode<synchronous>, transform_indices = @transform_2, window_bounds = array<i64: 1, 128>}, {transform_indices = @transform_3, window_bounds = array<i64: 128, 128>}]} {
    %c0 = arith.constant 0 : index
    %c0_0 = arith.constant 0 : index
    %0 = vector.load %arg1[%c0, %c0_0] : memref<128x54xbf16, #tpu.memory_space<vmem>>, vector<128x54xbf16>
    %c0_1 = arith.constant 0 : index
    %c0_2 = arith.constant 0 : index
    %1 = vector.load %arg2[%c0_1, %c0_2] : memref<54x128xbf16, #tpu.memory_space<vmem>>, vector<54x128xbf16>
    %cst = arith.constant dense<0.000000e+00> : vector<128x128xf32>
    %2 = tpu.matmul %0, %1, %cst {dimension_numbers = #tpu.dot_dimension_numbers<[1], [0], [0], [1], [0, 0, 1, 1], [], []>} : vector<128x54xbf16>, vector<54x128xbf16>, vector<128x128xf32> -> vector<128x128xf32>
    %c0_3 = arith.constant 0 : index
    %c0_4 = arith.constant 0 : index
    %3 = vector.load %arg3[%c0_3, %c0_4] : memref<1x128xf32, #tpu.memory_space<vmem>>, vector<1x128xf32>
    %4 = vector.broadcast %3 : vector<1x128xf32> to vector<128x128xf32>
    %5 = arith.addf %2, %4 : vector<128x128xf32>
    %cst_5 = arith.constant 0.000000e+00 : f32
    %6 = vector.broadcast %cst_5 : f32 to vector<128x128xf32>
    %7 = arith.maximumf %5, %6 : vector<128x128xf32>
    %8 = arith.truncf %7 : vector<128x128xf32> to vector<128x128xbf16>
    %c0_6 = arith.constant 0 : index
    %c0_7 = arith.constant 0 : index
    %9 = vector.load %arg4[%c0_6, %c0_7] : memref<128x128xbf16, #tpu.memory_space<vmem>>, vector<128x128xbf16>
    tpu.vector_store %arg4[%c0_6, %c0_7], %8 {strides = array<i32>} : memref<128x128xbf16, #tpu.memory_space<vmem>>, vector<128x128xbf16>,
    return
  }
  func.func @transform_0(%arg0: i32) -> (i32, i32) {
    %c0_i32 = arith.constant 0 : i32
    %c0_i32_0 = arith.constant 0 : i32
    return %arg0, %c0_i32 : i32, i32
  }
  func.func @transform_1(%arg0: i32) -> (i32, i32) {
    %c0_i32 = arith.constant 0 : i32
    %c0_i32_0 = arith.constant 0 : i32
    %c0_i32_1 = arith.constant 0 : i32
    return %c0_i32, %c0_i32_0 : i32, i32
  }
  func.func @transform_2(%arg0: i32) -> (i32, i32) {
    %c0_i32 = arith.constant 0 : i32
    %c0_i32_0 = arith.constant 0 : i32
    %c0_i32_1 = arith.constant 0 : i32
    return %c0_i32, %c0_i32_0 : i32, i32
  }
  func.func @transform_3(%arg0: i32) -> (i32, i32) {
    %c0_i32 = arith.constant 0 : i32
    %c0_i32_0 = arith.constant 0 : i32
    return %arg0, %c0_i32 : i32, i32
  }
}

module attributes {stable_mosaic.version = 11 : i64} {
  func.func @_matmul_bias_relu_kernel(%arg0: i32, %arg1: memref<128x54xbf16, #tpu.memory_space<vmem>>, %arg2: memref<54x128xbf16, #tpu.memory_space<vmem>>, %arg3: memref<1x128xf32, #tpu.memory_space<vmem>>, %arg4: memref<128x128xbf16, #tpu.memory_space<vmem>>) attributes {dimension_semantics = [#tpu.dimension_semantics<parallel>], iteration_bounds = array<i64: 2>, scalar_prefetch = 0 : i64, scratch_operands = 0 : i64, tpu.core_type = #tpu.core_type<tc>, window_params = [{transform_indices = @transform_0, window_bounds = array<i64: 128, 54>}, {pipeline_mode = #tpu.pipeline_mode<synchronous>, transform_indices = @transform_1, window_bounds = array<i64: 54, 128>}, {pipeline_mode = #tpu.pipeline_mode<synchronous>, transform_indices = @transform_2, window_bounds = array<i64: 1, 128>}, {transform_indices = @transform_3, window_bounds = array<i64: 128, 128>}]} {
    %c0 = arith.constant 0 : index
    %c0_0 = arith.constant 0 : index
    %0 = vector.load %arg1[%c0, %c0_0] : memref<128x54xbf16, #tpu.memory_space<vmem>>, vector<128x54xbf16>
    %c0_1 = arith.constant 0 : index
    %c0_2 = arith.constant 0 : index
    %1 = vector.load %arg2[%c0_1, %c0_2] : memref<54x128xbf16, #tpu.memory_space<vmem>>, vector<54x128xbf16>
    %cst = arith.constant dense<0.000000e+00> : vector<128x128xf32>
    %2 = tpu.matmul %0, %1, %cst {dimension_numbers = #tpu.dot_dimension_numbers<[1], [0], [0], [1], [0, 0, 1, 1], [], []>} : vector<128x54xbf16>, vector<54x128xbf16>, vector<128x128xf32> -> vector<128x128xf32>
    %c0_3 = arith.constant 0 : index
    %c0_4 = arith.constant 0 : index
    %3 = vector.load %arg3[%c0_3, %c0_4] : memref<1x128xf32, #tpu.memory_space<vmem>>, vector<1x128xf32>
    %4 = vector.broadcast %3 : vector<1x128xf32> to vector<128x128xf32>
    %5 = arith.addf %2, %4 : vector<128x128xf32>
    %cst_5 = arith.constant 0.000000e+00 : f32
    %6 = vector.broadcast %cst_5 : f32 to vector<128x128xf32>
    %7 = arith.maximumf %5, %6 : vector<128x128xf32>
    %8 = arith.truncf %7 : vector<128x128xf32> to vector<128x128xbf16>
    %c0_6 = arith.constant 0 : index
    %c0_7 = arith.constant 0 : index
    %9 = vector.load %arg4[%c0_6, %c0_7] : memref<128x128xbf16, #tpu.memory_space<vmem>>, vector<128x128xbf16>
    tpu.vector_store %arg4[%c0_6, %c0_7], %8 {strides = array<i32>} : memref<128x128xbf16, #tpu.memory_space<vmem>>, vector<128x128xbf16>,
    return
  }
  func.func @transform_0(%arg0: i32) -> (i32, i32) {
    %c0_i32 = arith.constant 0 : i32
    %c0_i32_0 = arith.constant 0 : i32
    return %arg0, %c0_i32 : i32, i32
  }
  func.func @transform_1(%arg0: i32) -> (i32, i32) {
    %c0_i32 = arith.constant 0 : i32
    %c0_i32_0 = arith.constant 0 : i32
    %c0_i32_1 = arith.constant 0 : i32
    return %c0_i32, %c0_i32_0 : i32, i32
  }
  func.func @transform_2(%arg0: i32) -> (i32, i32) {
    %c0_i32 = arith.constant 0 : i32
    %c0_i32_0 = arith.constant 0 : i32
    %c0_i32_1 = arith.constant 0 : i32
    return %c0_i32, %c0_i32_0 : i32, i32
  }
  func.func @transform_3(%arg0: i32) -> (i32, i32) {
    %c0_i32 = arith.constant 0 : i32
    %c0_i32_0 = arith.constant 0 : i32
    return %arg0, %c0_i32 : i32, i32
  }
}

</mosaic_0001>

<bundles_post_ra>
// kernel: tpu_custom_call.1
= control target key start
LH: loop header
LB: loop body
LE: loop exit
PB: predicated region body
PF: predicated region fallthrough
CT: control target
= control target key end

     0   :  { %8 = vsyncpa [#allocation3], 0  ;;  %s850_s0 = inlined_call_operand.vmem [shape: bf16[256,54], index: 0, kind: input, shape index: {}]   ;;  %s851_s1 = inlined_call_operand.vmem [shape: bf16[54,128], index: 1, kind: input, shape index: {}]   ;;  %s852_s2 = inlined_call_operand.vmem [shape: f32[1,128], index: 2, kind: input, shape index: {}]   ;;  %s853_s3 = inlined_call_operand.hbm [shape: bf16[256,128], index: 3, kind: output, shape index: {}]  }
   0x1   :  { %10 = vsyncpa [#allocation3 + $0x1], 0  ;;  %s728_s12 = smov 0   ;;  %s730_s13 = smov 0  }
   0x2   :  { %s732_s14 = smov 0   ;;  %s734_s15 = smov 0  }
   0x3 LB: > { %s749_s16 = sadd.s32 4294967295, %s704_s15   ;;  %s465_s17 = sadd.s32 4294967294, %s704_s15   ;;  %s704_s15 = sphi %s734_s15, %s859_s15   ;;  %s700_s14 = sphi %s732_s14, %s858_s14   ;;  %s696_s13 = sphi %s730_s13, %s857_s13   ;;  %s692_s12 = sphi %s728_s12, %s856_s12  }
   0x4   : > { %s753_s18 = sadd.s32 1, %s704_s15   ;;  %s91_s19 = sadd.s32 1, %s700_s14 }
   0x5   : > { %s88_s20 = ssub.s32 %s704_s15, %s753_s18  ;;  %p101_p0 = scmp.ne.s32.totalorder %s700_s14, %s696_s13 }
   0x6   : > { %p89_p1 = scmp.eq.s32.totalorder %s88_s20, 0  ;;  %p102_p2 = scmp.eq.s32.totalorder %s749_s16, 1 }
   0x7   : > { %p107_p3 = scmp.ne.s32.totalorder %s696_s13, %s692_s12  ;;  %p108_p4 = scmp.eq.s32.totalorder %s465_s17, 1 }
   0x8   : > { %s764_s21 = scalar_select %p89_p1, %s700_s14, %s91_s19  }
   0x9   : > { %p766_p5 = por %p102_p2, %p101_p0  ;;  %p770_p6 = por %p108_p4, %p107_p3 }
   0xa   : > { %p468_p7 = scmp.ge.s32.totalorder %s704_s15, 1  ;;  %p141_p8 = scmp.lt.s32.totalorder %s704_s15, 3 }
   0xc   : > { %p142_p9 = pnand %p468_p7, %p141_p8 }
   0xd   : > { %s470_s26 = sshll.u32 (!%p142_p9), %s749_s16, 4  ;;  %s162_s17 = sand.u32 (!%p142_p9), 1, %s696_s13  }
   0xe   : > { %145 = sbr.rel (%p142_p9) target bundleno = 208 (0xd0), region = 32  ;;  %p166_p10 = scmp.lt.s32.totalorder (!%p142_p9), %s470_s26, 31 }
   0xf   : > { %s469_s19 = sshll.u32 (!%p142_p9), %s162_s17, 6  ;;  %s540_s24 = sshll.u32 (!%p142_p9), %s749_s16, 6 }
  0x10   : > { %s806_s20 = scalar_lea.vmem (!%p142_p9), [#allocation2], %s469_s19  ;;  %s399_s27 = scalar_lea.hbm (!%p142_p9), %s853_s3, %s540_s24 }
  0x11   : > { %s400_s28 = sshll.u32 (!%p142_p9), %s806_s20, 4  ;;  %s402_s29 = sshll.u32 (!%p142_p9), %s399_s27, 4  ;;  %s401_s28 = int_to_ptr.vmem [resolvable:$true] %s400_s28  ;;  %s403_s29 = int_to_ptr.hbm [resolvable:$true] %s402_s29 }
  0x12   : > { %s388_s16 = scalar_lea.sflag (!%p142_p9), [#allocation3], %s162_s17  ;;  %s656_s30 = sshra.s32 (!%p142_p9), %s403_s29, 4  ;;  %s657_s30 = int_to_ptr.hbm [resolvable:$true] %s656_s30 }
  0x13   : > { %v195_v0 = vld [vmem:[%s851_s1 + $0x18] sm:$0x7]  ;;  %vm286_vm0 = vcmask 1042432   ;;  %v539_v4 = vld [vmem:[%s851_s1 + $0x10] sm:$0xff]  ;;  %s861_s26 = smov (!%p166_p10, %s470_s26), 31  ;;  %v538_v5 = vld [vmem:[%s851_s1 + $0x8] sm:$0xff]  ;;  %p663_p0 = scmp.lt.s32.totalorder %s657_s30, %s853_s3 }
  0x14   : > { %v253_v1 = vunpack.c.l.b16 %v195_v0  ;;  %s471_s4 = sshll.u32 %s861_s26, 2  ;;  %v537_v6 = vld [vmem:[%s851_s1] sm:$0xff]  ;;  %vm261_vm1 = vcmask 441344   ;;  %s662_s7 = scalar_lea.hbm %s853_s3, 128 }
  0x15   : > { %s169_s9 = scalar_lea.vmem %s850_s0, %s471_s4  ;;  %v641_v17 = vld [vmem:[%s852_s2] ss:$0 sm:$0xff]  ;;  %s658_s4 = scalar_lea.hbm %s657_s30, 64 }
  0x16   : > { %v257_v2 = vpack.c.b16 %v253_v1, %v253_v1  ;;  %v529_v7 = vld [vmem:[%s169_s9] sm:$0xff]  ;;  %v531_v8 = vld [vmem:[%s169_s9 + $0x10] sm:$0xff]  ;;  %v530_v11 = vld [vmem:[%s169_s9 + $0x8] sm:$0xff]  ;;  %p659_p11 = scmp.ne.s32.totalorder %s657_s30, %s658_s4  ;;  %p664_p1 = scmp.lt.s32.totalorder %s662_s7, %s658_s4 }
  0x17   : > { %v533_v9 = vld [vmem:[%s169_s9 + $0x20] sm:$0xff]  ;;  %v535_v10 = vld [vmem:[%s169_s9 + $0x30] sm:$0xff]  ;;  %v532_v12 = vld [vmem:[%s169_s9 + $0x18] sm:$0xff] }
  0x18   : > { %v288_v3 = vsel %vm286_vm0, %v257_v2, 0  ;;  %v534_v13 = vld [vmem:[%s169_s9 + $0x28] sm:$0xff]  ;;  %v536_v14 = vld [vmem:[%s169_s9 + $0x38] sm:$0xff]  ;;  %p660_p12 = pnand %p659_p11, %p766_p5  ;;  %p665_p2 = por %p664_p1, %p663_p0 }
  0x19   : > { %294 = vmatpush.bf16.msra.mxu0 %v288_v3  ;;  %588 = vmatpush.bf16.msra.mxu1 %v288_v3 }
  0x1a   : > { %589 = vmatpush.bf16.msra.mxu2 %v288_v3  ;;  %590 = vmatpush.bf16.msra.mxu3 %v288_v3  ;;  %p661_p13 = pneg %p660_p12 }
  0x1c   : > { %p666_p3 = pnand %p665_p2, %p661_p13 }
  0x1d   : > { %295 = vmatpush.bf16.msra.mxu0 %v539_v4  ;;  %591 = vmatpush.bf16.msra.mxu1 %v539_v4 }
  0x1e   : > { %592 = vmatpush.bf16.msra.mxu2 %v539_v4  ;;  %593 = vmatpush.bf16.msra.mxu3 %v539_v4 }
  0x21   : > { %296 = vmatpush.bf16.msra.mxu0 %v538_v5  ;;  %594 = vmatpush.bf16.msra.mxu1 %v538_v5 }
  0x22   : > { %595 = vmatpush.bf16.msra.mxu2 %v538_v5  ;;  %596 = vmatpush.bf16.msra.mxu3 %v538_v5 }
  0x25   : > { %297 = vmatpush.bf16.msra.mxu0 %v537_v6  ;;  %597 = vmatpush.bf16.msra.mxu1 %v537_v6 }
  0x26   : > { %598 = vmatpush.bf16.msra.mxu2 %v537_v6  ;;  %599 = vmatpush.bf16.msra.mxu3 %v537_v6 }
  0x28   : > { %516 = vmatmul.msk.bf16.vlgmr.msra.gmra.mxu0 %vm261_vm1, %v529_v7  ;;  %518 = vmatmul.msk.bf16.vlgmr.msra.gmra.mxu1 %vm261_vm1, %v531_v8 }
  0x29   : > { %520 = vmatmul.msk.bf16.vlgmr.msra.gmra.mxu2 %vm261_vm1, %v533_v9  ;;  %522 = vmatmul.msk.bf16.vlgmr.msra.gmra.mxu3 %vm261_vm1, %v535_v10 }
  0x38   : > { %517 = vmatmul.msk.bf16.gmra.mxu0 %vm261_vm1, %v530_v11  ;;  %519 = vmatmul.msk.bf16.gmra.mxu1 %vm261_vm1, %v532_v12 }
  0x39   : > { %521 = vmatmul.msk.bf16.gmra.mxu2 %vm261_vm1, %v534_v13  ;;  %523 = vmatmul.msk.bf16.gmra.mxu3 %vm261_vm1, %v536_v14 }
  0xa5   : > { %v299_v15 = vpop.f32.mrf.mxu0  ;;  %v309_v16 = vpop.f32.mrf.mxu1 }
  0xa6   : > { %v300_v18 = vadd.f32 %v641_v17, %v299_v15  ;;  %v310_v19 = vadd.f32 %v641_v17, %v309_v16 }
  0xa8   : > { %v339_v26 = vmax.f32 %v300_v18, 0.0  ;;  %v343_v27 = vmax.f32 %v310_v19, 0.0 }
  0xac   : > { %v319_v20 = vpop.f32.mrf.mxu2  ;;  %v329_v21 = vpop.f32.mrf.mxu3 }
  0xad   : > { %v301_v22 = vpop.f32.mrf.mxu0  ;;  %v311_v23 = vpop.f32.mrf.mxu1  ;;  %v320_v32 = vadd.f32 %v641_v17, %v319_v20  ;;  %v330_v33 = vadd.f32 %v641_v17, %v329_v21 }
  0xae   : > { %v302_v24 = vadd.f32 %v641_v17, %v301_v22  ;;  %v312_v25 = vadd.f32 %v641_v17, %v311_v23 }
  0xaf   : > { %v347_v40 = vmax.f32 %v320_v32, 0.0  ;;  %v351_v41 = vmax.f32 %v330_v33, 0.0 }
  0xb0   : > { %v340_v28 = vmax.f32 %v302_v24, 0.0  ;;  %v344_v29 = vmax.f32 %v312_v25, 0.0 }
  0xb2   : > { %v544_v30 = vpack.c.bf16 %v340_v28, %v339_v26  ;;  %v554_v31 = vpack.c.bf16 %v344_v29, %v343_v27 }
  0xb4   : > { %545 = vst [vmem:[%s806_s20] sm:$0xff] %v544_v30   ;;  %v321_v34 = vpop.f32.mrf.mxu2  ;;  %v331_v35 = vpop.f32.mrf.mxu3 }
  0xb5   : > { %582 = vst [vmem:[%s806_s20 + $0x10] sm:$0xff] %v554_v31   ;;  %v322_v36 = vadd.f32 %v641_v17, %v321_v34  ;;  %v332_v37 = vadd.f32 %v641_v17, %v331_v35  ;;  %v304_v38 = vpop.f32.mrf.mxu0  ;;  %v314_v39 = vpop.f32.mrf.mxu1 }
  0xb6   : > { %v305_v46 = vadd.f32 %v641_v17, %v304_v38  ;;  %v315_v47 = vadd.f32 %v641_v17, %v314_v39 }
  0xb7   : > { %v348_v42 = vmax.f32 %v322_v36, 0.0  ;;  %v352_v43 = vmax.f32 %v332_v37, 0.0 }
  0xb8   : > { %v341_v54 = vmax.f32 %v305_v46, 0.0  ;;  %v345_v55 = vmax.f32 %v315_v47, 0.0 }
  0xb9   : > { %v564_v44 = vpack.c.bf16 %v348_v42, %v347_v40  ;;  %v574_v45 = vpack.c.bf16 %v352_v43, %v351_v41 }
  0xbb   : > { %584 = vst [vmem:[%s806_s20 + $0x20] sm:$0xff] %v564_v44  }
  0xbc   : > { %586 = vst [vmem:[%s806_s20 + $0x30] sm:$0xff] %v574_v45   ;;  %v324_v48 = vpop.f32.mrf.mxu2  ;;  %v334_v49 = vpop.f32.mrf.mxu3 }
  0xbd   : > { %v306_v50 = vpop.f32.mrf.mxu0  ;;  %v316_v51 = vpop.f32.mrf.mxu1  ;;  %v325_v60 = vadd.f32 %v641_v17, %v324_v48  ;;  %v335_v61 = vadd.f32 %v641_v17, %v334_v49 }
  0xbe   : > { %v307_v52 = vadd.f32 %v641_v17, %v306_v50  ;;  %v317_v53 = vadd.f32 %v641_v17, %v316_v51 }
  0xbf   : > { %v349_v2 = vmax.f32 %v325_v60, 0.0  ;;  %v353_v3 = vmax.f32 %v335_v61, 0.0 }
  0xc0   : > { %v342_v56 = vmax.f32 %v307_v52, 0.0  ;;  %v346_v57 = vmax.f32 %v317_v53, 0.0 }
  0xc2   : > { %v549_v58 = vpack.c.bf16 %v342_v56, %v341_v54  ;;  %v559_v59 = vpack.c.bf16 %v346_v57, %v345_v55 }
  0xc4   : > { %581 = vst [vmem:[%s806_s20 + $0x8] sm:$0xff] %v549_v58   ;;  %v326_v62 = vpop.f32.mrf.mxu2  ;;  %v336_v63 = vpop.f32.mrf.mxu3 }
  0xc5   : > { %583 = vst [vmem:[%s806_s20 + $0x18] sm:$0xff] %v559_v59   ;;  %v327_v0 = vadd.f32 %v641_v17, %v326_v62  ;;  %v337_v1 = vadd.f32 %v641_v17, %v336_v63 }
  0xc7   : > { %v350_v4 = vmax.f32 %v327_v0, 0.0  ;;  %v354_v5 = vmax.f32 %v337_v1, 0.0 }
  0xc9   : > { %v569_v6 = vpack.c.bf16 %v350_v4, %v349_v2  ;;  %v579_v7 = vpack.c.bf16 %v354_v5, %v353_v3 }
  0xcb   : > { %585 = vst [vmem:[%s806_s20 + $0x28] sm:$0xff] %v569_v6  }
  0xcc   : > { %587 = vst [vmem:[%s806_s20 + $0x38] sm:$0xff] %v579_v7  }
  0xcd   : > { %669 = shalt.err (!%p666_p3)
}
  0xce   : > { %s706_s10 = smov 64   ;;  %s707_s11 = smov 4  }
  0xcf   : > { %600 = dma.vmem_to_hbm [thread:$0]  (%p766_p5), %s401_s28, 1024, %s403_s29, %s388_s16, %s706_s10, %s706_s10, %s707_s11  }
  0xd0 PF: > { %p606_p4 = scmp.ge.s32.totalorder %s704_s15, 2  ;;  %s417_s17 = sand.u32 1, %s692_s12  }
  0xd1   : > { %s418_s19 = scalar_lea.sflag [#allocation3], %s417_s17 }
  0xd2   : > { %p603_p7 = pnand %p606_p4, %p770_p6 }
  0xd4   : > { %p604_p8 = pneg %p603_p7 }
  0xd6   : > { %687 = dma.done.wait (%p604_p8), %s418_s19, 1024  }
  0xd7   : > { %689 = vsyncadd (%p604_p8), %s418_s19, 4294966272  ;;  %p13_p9 = scmp.ge.s32.totalorder %s753_s18, 4   ;;  %s856_s12 = smov %s696_s13 }
  0xd8   : > { %s857_s13 = smov %s700_s14  ;;  %s858_s14 = smov %s764_s21 }
  0xd9   : > { %s859_s15 = smov %s753_s18  ;;  %15 = sbr.rel (!%p13_p9) target bundleno = 3 (0x3), region = 67 }
  0xde   :  { %424 = vsyncpa [#allocation3], 1 }
  0xdf   :  { %426 = vsyncpa [#allocation3 + $0x1], 1 }

// kernel: tpu_custom_call.1
= control target key start
LH: loop header
LB: loop body
LE: loop exit
PB: predicated region body
PF: predicated region fallthrough
CT: control target
= control target key end

     0   :  { %8 = vsyncpa [#allocation3], 0  ;;  %s850_s0 = inlined_call_operand.vmem [shape: bf16[256,54], index: 0, kind: input, shape index: {}]   ;;  %s851_s1 = inlined_call_operand.vmem [shape: bf16[54,128], index: 1, kind: input, shape index: {}]   ;;  %s852_s2 = inlined_call_operand.vmem [shape: f32[1,128], index: 2, kind: input, shape index: {}]   ;;  %s853_s3 = inlined_call_operand.hbm [shape: bf16[256,128], index: 3, kind: output, shape index: {}]  }
   0x1   :  { %10 = vsyncpa [#allocation3 + $0x1], 0  ;;  %s728_s12 = smov 0   ;;  %s730_s13 = smov 0  }
   0x2   :  { %s732_s14 = smov 0   ;;  %s734_s15 = smov 0  }
   0x3 LB: > { %s749_s16 = sadd.s32 4294967295, %s704_s15   ;;  %s465_s17 = sadd.s32 4294967294, %s704_s15   ;;  %s704_s15 = sphi %s734_s15, %s859_s15   ;;  %s700_s14 = sphi %s732_s14, %s858_s14   ;;  %s696_s13 = sphi %s730_s13, %s857_s13   ;;  %s692_s12 = sphi %s728_s12, %s856_s12  }
   0x4   : > { %s753_s18 = sadd.s32 1, %s704_s15   ;;  %s91_s19 = sadd.s32 1, %s700_s14 }
   0x5   : > { %s88_s20 = ssub.s32 %s704_s15, %s753_s18  ;;  %p101_p0 = scmp.ne.s32.totalorder %s700_s14, %s696_s13 }
   0x6   : > { %p89_p1 = scmp.eq.s32.totalorder %s88_s20, 0  ;;  %p102_p2 = scmp.eq.s32.totalorder %s749_s16, 1 }
   0x7   : > { %p107_p3 = scmp.ne.s32.totalorder %s696_s13, %s692_s12  ;;  %p108_p4 = scmp.eq.s32.totalorder %s465_s17, 1 }
   0x8   : > { %s764_s21 = scalar_select %p89_p1, %s700_s14, %s91_s19  }
   0x9   : > { %p766_p5 = por %p102_p2, %p101_p0  ;;  %p770_p6 = por %p108_p4, %p107_p3 }
   0xa   : > { %p468_p7 = scmp.ge.s32.totalorder %s704_s15, 1  ;;  %p141_p8 = scmp.lt.s32.totalorder %s704_s15, 3 }
   0xc   : > { %p142_p9 = pnand %p468_p7, %p141_p8 }
   0xd   : > { %s470_s26 = sshll.u32 (!%p142_p9), %s749_s16, 4  ;;  %s162_s17 = sand.u32 (!%p142_p9), 1, %s696_s13  }
   0xe   : > { %145 = sbr.rel (%p142_p9) target bundleno = 208 (0xd0), region = 32  ;;  %p166_p10 = scmp.lt.s32.totalorder (!%p142_p9), %s470_s26, 31 }
   0xf   : > { %s469_s19 = sshll.u32 (!%p142_p9), %s162_s17, 6  ;;  %s540_s24 = sshll.u32 (!%p142_p9), %s749_s16, 6 }
  0x10   : > { %s806_s20 = scalar_lea.vmem (!%p142_p9), [#allocation2], %s469_s19  ;;  %s399_s27 = scalar_lea.hbm (!%p142_p9), %s853_s3, %s540_s24 }
  0x11   : > { %s400_s28 = sshll.u32 (!%p142_p9), %s806_s20, 4  ;;  %s402_s29 = sshll.u32 (!%p142_p9), %s399_s27, 4  ;;  %s401_s28 = int_to_ptr.vmem [resolvable:$true] %s400_s28  ;;  %s403_s29 = int_to_ptr.hbm [resolvable:$true] %s402_s29 }
  0x12   : > { %s388_s16 = scalar_lea.sflag (!%p142_p9), [#allocation3], %s162_s17  ;;  %s656_s30 = sshra.s32 (!%p142_p9), %s403_s29, 4  ;;  %s657_s30 = int_to_ptr.hbm [resolvable:$true] %s656_s30 }
  0x13   : > { %v195_v0 = vld [vmem:[%s851_s1 + $0x18] sm:$0x7]  ;;  %vm286_vm0 = vcmask 1042432   ;;  %v539_v4 = vld [vmem:[%s851_s1 + $0x10] sm:$0xff]  ;;  %s861_s26 = smov (!%p166_p10, %s470_s26), 31  ;;  %v538_v5 = vld [vmem:[%s851_s1 + $0x8] sm:$0xff]  ;;  %p663_p0 = scmp.lt.s32.totalorder %s657_s30, %s853_s3 }
  0x14   : > { %v253_v1 = vunpack.c.l.b16 %v195_v0  ;;  %s471_s4 = sshll.u32 %s861_s26, 2  ;;  %v537_v6 = vld [vmem:[%s851_s1] sm:$0xff]  ;;  %vm261_vm1 = vcmask 441344   ;;  %s662_s7 = scalar_lea.hbm %s853_s3, 128 }
  0x15   : > { %s169_s9 = scalar_lea.vmem %s850_s0, %s471_s4  ;;  %v641_v17 = vld [vmem:[%s852_s2] ss:$0 sm:$0xff]  ;;  %s658_s4 = scalar_lea.hbm %s657_s30, 64 }
  0x16   : > { %v257_v2 = vpack.c.b16 %v253_v1, %v253_v1  ;;  %v529_v7 = vld [vmem:[%s169_s9] sm:$0xff]  ;;  %v531_v8 = vld [vmem:[%s169_s9 + $0x10] sm:$0xff]  ;;  %v530_v11 = vld [vmem:[%s169_s9 + $0x8] sm:$0xff]  ;;  %p659_p11 = scmp.ne.s32.totalorder %s657_s30, %s658_s4  ;;  %p664_p1 = scmp.lt.s32.totalorder %s662_s7, %s658_s4 }
  0x17   : > { %v533_v9 = vld [vmem:[%s169_s9 + $0x20] sm:$0xff]  ;;  %v535_v10 = vld [vmem:[%s169_s9 + $0x30] sm:$0xff]  ;;  %v532_v12 = vld [vmem:[%s169_s9 + $0x18] sm:$0xff] }
  0x18   : > { %v288_v3 = vsel %vm286_vm0, %v257_v2, 0  ;;  %v534_v13 = vld [vmem:[%s169_s9 + $0x28] sm:$0xff]  ;;  %v536_v14 = vld [vmem:[%s169_s9 + $0x38] sm:$0xff]  ;;  %p660_p12 = pnand %p659_p11, %p766_p5  ;;  %p665_p2 = por %p664_p1, %p663_p0 }
  0x19   : > { %294 = vmatpush.bf16.msra.mxu0 %v288_v3  ;;  %588 = vmatpush.bf16.msra.mxu1 %v288_v3 }
  0x1a   : > { %589 = vmatpush.bf16.msra.mxu2 %v288_v3  ;;  %590 = vmatpush.bf16.msra.mxu3 %v288_v3  ;;  %p661_p13 = pneg %p660_p12 }
  0x1c   : > { %p666_p3 = pnand %p665_p2, %p661_p13 }
  0x1d   : > { %295 = vmatpush.bf16.msra.mxu0 %v539_v4  ;;  %591 = vmatpush.bf16.msra.mxu1 %v539_v4 }
  0x1e   : > { %592 = vmatpush.bf16.msra.mxu2 %v539_v4  ;;  %593 = vmatpush.bf16.msra.mxu3 %v539_v4 }
  0x21   : > { %296 = vmatpush.bf16.msra.mxu0 %v538_v5  ;;  %594 = vmatpush.bf16.msra.mxu1 %v538_v5 }
  0x22   : > { %595 = vmatpush.bf16.msra.mxu2 %v538_v5  ;;  %596 = vmatpush.bf16.msra.mxu3 %v538_v5 }
  0x25   : > { %297 = vmatpush.bf16.msra.mxu0 %v537_v6  ;;  %597 = vmatpush.bf16.msra.mxu1 %v537_v6 }
  0x26   : > { %598 = vmatpush.bf16.msra.mxu2 %v537_v6  ;;  %599 = vmatpush.bf16.msra.mxu3 %v537_v6 }
  0x28   : > { %516 = vmatmul.msk.bf16.vlgmr.msra.gmra.mxu0 %vm261_vm1, %v529_v7  ;;  %518 = vmatmul.msk.bf16.vlgmr.msra.gmra.mxu1 %vm261_vm1, %v531_v8 }
  0x29   : > { %520 = vmatmul.msk.bf16.vlgmr.msra.gmra.mxu2 %vm261_vm1, %v533_v9  ;;  %522 = vmatmul.msk.bf16.vlgmr.msra.gmra.mxu3 %vm261_vm1, %v535_v10 }
  0x38   : > { %517 = vmatmul.msk.bf16.gmra.mxu0 %vm261_vm1, %v530_v11  ;;  %519 = vmatmul.msk.bf16.gmra.mxu1 %vm261_vm1, %v532_v12 }
  0x39   : > { %521 = vmatmul.msk.bf16.gmra.mxu2 %vm261_vm1, %v534_v13  ;;  %523 = vmatmul.msk.bf16.gmra.mxu3 %vm261_vm1, %v536_v14 }
  0xa5   : > { %v299_v15 = vpop.f32.mrf.mxu0  ;;  %v309_v16 = vpop.f32.mrf.mxu1 }
  0xa6   : > { %v300_v18 = vadd.f32 %v641_v17, %v299_v15  ;;  %v310_v19 = vadd.f32 %v641_v17, %v309_v16 }
  0xa8   : > { %v339_v26 = vmax.f32 %v300_v18, 0.0  ;;  %v343_v27 = vmax.f32 %v310_v19, 0.0 }
  0xac   : > { %v319_v20 = vpop.f32.mrf.mxu2  ;;  %v329_v21 = vpop.f32.mrf.mxu3 }
  0xad   : > { %v301_v22 = vpop.f32.mrf.mxu0  ;;  %v311_v23 = vpop.f32.mrf.mxu1  ;;  %v320_v32 = vadd.f32 %v641_v17, %v319_v20  ;;  %v330_v33 = vadd.f32 %v641_v17, %v329_v21 }
  0xae   : > { %v302_v24 = vadd.f32 %v641_v17, %v301_v22  ;;  %v312_v25 = vadd.f32 %v641_v17, %v311_v23 }
  0xaf   : > { %v347_v40 = vmax.f32 %v320_v32, 0.0  ;;  %v351_v41 = vmax.f32 %v330_v33, 0.0 }
  0xb0   : > { %v340_v28 = vmax.f32 %v302_v24, 0.0  ;;  %v344_v29 = vmax.f32 %v312_v25, 0.0 }
  0xb2   : > { %v544_v30 = vpack.c.bf16 %v340_v28, %v339_v26  ;;  %v554_v31 = vpack.c.bf16 %v344_v29, %v343_v27 }
  0xb4   : > { %545 = vst [vmem:[%s806_s20] sm:$0xff] %v544_v30   ;;  %v321_v34 = vpop.f32.mrf.mxu2  ;;  %v331_v35 = vpop.f32.mrf.mxu3 }
  0xb5   : > { %582 = vst [vmem:[%s806_s20 + $0x10] sm:$0xff] %v554_v31   ;;  %v322_v36 = vadd.f32 %v641_v17, %v321_v34  ;;  %v332_v37 = vadd.f32 %v641_v17, %v331_v35  ;;  %v304_v38 = vpop.f32.mrf.mxu0  ;;  %v314_v39 = vpop.f32.mrf.mxu1 }
  0xb6   : > { %v305_v46 = vadd.f32 %v641_v17, %v304_v38  ;;  %v315_v47 = vadd.f32 %v641_v17, %v314_v39 }
  0xb7   : > { %v348_v42 = vmax.f32 %v322_v36, 0.0  ;;  %v352_v43 = vmax.f32 %v332_v37, 0.0 }
  0xb8   : > { %v341_v54 = vmax.f32 %v305_v46, 0.0  ;;  %v345_v55 = vmax.f32 %v315_v47, 0.0 }
  0xb9   : > { %v564_v44 = vpack.c.bf16 %v348_v42, %v347_v40  ;;  %v574_v45 = vpack.c.bf16 %v352_v43, %v351_v41 }
  0xbb   : > { %584 = vst [vmem:[%s806_s20 + $0x20] sm:$0xff] %v564_v44  }
  0xbc   : > { %586 = vst [vmem:[%s806_s20 + $0x30] sm:$0xff] %v574_v45   ;;  %v324_v48 = vpop.f32.mrf.mxu2  ;;  %v334_v49 = vpop.f32.mrf.mxu3 }
  0xbd   : > { %v306_v50 = vpop.f32.mrf.mxu0  ;;  %v316_v51 = vpop.f32.mrf.mxu1  ;;  %v325_v60 = vadd.f32 %v641_v17, %v324_v48  ;;  %v335_v61 = vadd.f32 %v641_v17, %v334_v49 }
  0xbe   : > { %v307_v52 = vadd.f32 %v641_v17, %v306_v50  ;;  %v317_v53 = vadd.f32 %v641_v17, %v316_v51 }
  0xbf   : > { %v349_v2 = vmax.f32 %v325_v60, 0.0  ;;  %v353_v3 = vmax.f32 %v335_v61, 0.0 }
  0xc0   : > { %v342_v56 = vmax.f32 %v307_v52, 0.0  ;;  %v346_v57 = vmax.f32 %v317_v53, 0.0 }
  0xc2   : > { %v549_v58 = vpack.c.bf16 %v342_v56, %v341_v54  ;;  %v559_v59 = vpack.c.bf16 %v346_v57, %v345_v55 }
  0xc4   : > { %581 = vst [vmem:[%s806_s20 + $0x8] sm:$0xff] %v549_v58   ;;  %v326_v62 = vpop.f32.mrf.mxu2  ;;  %v336_v63 = vpop.f32.mrf.mxu3 }
  0xc5   : > { %583 = vst [vmem:[%s806_s20 + $0x18] sm:$0xff] %v559_v59   ;;  %v327_v0 = vadd.f32 %v641_v17, %v326_v62  ;;  %v337_v1 = vadd.f32 %v641_v17, %v336_v63 }
  0xc7   : > { %v350_v4 = vmax.f32 %v327_v0, 0.0  ;;  %v354_v5 = vmax.f32 %v337_v1, 0.0 }
  0xc9   : > { %v569_v6 = vpack.c.bf16 %v350_v4, %v349_v2  ;;  %v579_v7 = vpack.c.bf16 %v354_v5, %v353_v3 }
  0xcb   : > { %585 = vst [vmem:[%s806_s20 + $0x28] sm:$0xff] %v569_v6  }
  0xcc   : > { %587 = vst [vmem:[%s806_s20 + $0x38] sm:$0xff] %v579_v7  }
  0xcd   : > { %669 = shalt.err (!%p666_p3)
}
  0xce   : > { %s706_s10 = smov 64   ;;  %s707_s11 = smov 4  }
  0xcf   : > { %600 = dma.vmem_to_hbm [thread:$0]  (%p766_p5), %s401_s28, 1024, %s403_s29, %s388_s16, %s706_s10, %s706_s10, %s707_s11  }
  0xd0 PF: > { %p606_p4 = scmp.ge.s32.totalorder %s704_s15, 2  ;;  %s417_s17 = sand.u32 1, %s692_s12  }
  0xd1   : > { %s418_s19 = scalar_lea.sflag [#allocation3], %s417_s17 }
  0xd2   : > { %p603_p7 = pnand %p606_p4, %p770_p6 }
  0xd4   : > { %p604_p8 = pneg %p603_p7 }
  0xd6   : > { %687 = dma.done.wait (%p604_p8), %s418_s19, 1024  }
  0xd7   : > { %689 = vsyncadd (%p604_p8), %s418_s19, 4294966272  ;;  %p13_p9 = scmp.ge.s32.totalorder %s753_s18, 4   ;;  %s856_s12 = smov %s696_s13 }
  0xd8   : > { %s857_s13 = smov %s700_s14  ;;  %s858_s14 = smov %s764_s21 }
  0xd9   : > { %s859_s15 = smov %s753_s18  ;;  %15 = sbr.rel (!%p13_p9) target bundleno = 3 (0x3), region = 67 }
  0xde   :  { %424 = vsyncpa [#allocation3], 1 }
  0xdf   :  { %426 = vsyncpa [#allocation3 + $0x1], 1 }

</bundles_post_ra>
